<compile_context>
chip_gen: v5e
topology: v5e:2x2
jax: 0.10.0
libtpu: 0.0.40
codegen_flags: <defaults>
</compile_context>

<pallas_src>
import numpy as np

import jax
import jax.numpy as jnp
from jax import lax
from jax.experimental import pallas as pl
from jax.experimental.pallas import tpu as pltpu

_EPS = 1e-8        # torch.nn.functional.cosine_similarity default eps
_SLAB_ROWS = 72    # packed MLP-parameter slab is (72, 128) f32; rows 8:72 = fc2


def _meta_model_kernel(u_rows_ref, i_rows_ref,        # SMEM scalar prefetch (B, M)
                       ptab_ref, qtab_ref, slab_ref,  # VMEM inputs
                       o_ref):                        # VMEM output block (1, 1, M)
    b = pl.program_id(0)
    m = o_ref.shape[-1]                               # number of sub-models

    # ---- per-model row gather: M dynamic sublane slices, O(M*D) ------------
    # (replaces the one-hot MXU gather; cost independent of table size)
    # TODO(synk): no bounds check on row indices (torch would raise on OOB).
    u = jnp.concatenate(
        [ptab_ref[pl.ds(u_rows_ref[b, j], 1), :] for j in range(m)], axis=0
    ).astype(jnp.float32)                                             # (M, D)
    v = jnp.concatenate(
        [qtab_ref[pl.ds(i_rows_ref[b, j], 1), :] for j in range(m)], axis=0
    ).astype(jnp.float32)                                             # (M, D)

    # ---- per-model cosine similarity (ATen clamp semantics) ----------------
    w12 = jnp.sum(u * v, axis=-1, keepdims=True)                      # (M, 1)
    wuu = jnp.sum(u * u, axis=-1, keepdims=True)
    wvv = jnp.sum(v * v, axis=-1, keepdims=True)
    x = w12 * lax.rsqrt(jnp.maximum(wuu * wvv, _EPS * _EPS))          # (M, 1)

    # ---- MLP params: static slices of the single packed slab ---------------
    w1 = slab_ref[0:1, 0:64]                                          # (1, 64)
    b1 = slab_ref[1:2, 0:64]                                          # (1, 64)
    b2 = slab_ref[2:3, 0:32]                                          # (1, 32)
    w3 = slab_ref[3:4, 0:32]                                          # (1, 32)
    b3 = slab_ref[4:5, 0:1]                                           # (1, 1)
    w2 = slab_ref[8:_SLAB_ROWS, 0:32]                                 # (64, 32)

    # fc1 has in_features=1 -> broadcast multiply, not a matmul.
    h1 = jnp.maximum(x * w1 + b1, 0.0)                                # (M, 64)
    h2 = jnp.maximum(
        jnp.dot(h1, w2, preferred_element_type=jnp.float32) + b2, 0.0)  # (M, 32)
    # fc3 as (1,32) contracted with (M,32) -> lane-major (1, M) row.
    y = lax.dot_general(w3, h2, dimension_numbers=(((1,), (1,)), ((), ())),
                        preferred_element_type=jnp.float32) + b3       # (1, M)
    o_ref[...] = y.reshape(o_ref.shape).astype(o_ref.dtype)


def make_meta_model(persona_tables, program_tables, params):
    """One-time setup (tables, offsets, packed params); returns jitted forwards.

    persona_tables : list of M arrays (num_users_m, D)  (sub-model m's users)
    program_tables : list of M arrays (num_items_m, D)  (sub-model m's items)
    params         : (w1 (1,64), b1 (1,64), w2 (64,32), b2 (1,32),
                      w3 (1,32), b3 (1,1)) -- torch Linear weights stored
                      (in, out) except fc3 which is torch-native (out, in).

    Returns (forward, batched):
      forward(user_ids, item_ids)  -> (M,)     original single-pair semantics
      batched(user_ids, item_ids)  -> (B, M)   B pairs per call
    """
    w1, b1, w2, b2, w3, b3 = params
    num_models = len(persona_tables)
    d = persona_tables[0].shape[1]

    # Hoisted out of the per-call path: concatenated tables + row offsets.
    p_off = np.concatenate(
        [[0], np.cumsum([t.shape[0] for t in persona_tables])[:-1]]).astype(np.int32)
    q_off = np.concatenate(
        [[0], np.cumsum([t.shape[0] for t in program_tables])[:-1]]).astype(np.int32)
    ptab = jnp.concatenate(persona_tables, axis=0)     # (TP, D)
    qtab = jnp.concatenate(program_tables, axis=0)     # (TQ, D)
    # TODO(synk): for large tables on v6e/v7x store ptab/qtab in bf16 (kernel
    # already casts rows to f32), and beyond ~tens of MiB keep tables in HBM
    # (memory_space=pl.ANY) and DMA only the needed rows.
    p_off_j = jnp.asarray(p_off)
    q_off_j = jnp.asarray(q_off)
    tp, tq = ptab.shape[0], qtab.shape[0]

    # Six tiny params -> ONE (8,128)-aligned f32 slab -> one VMEM input DMA.
    slab_np = np.zeros((_SLAB_ROWS, 128), np.float32)
    slab_np[0, :64] = np.asarray(w1, np.float32).reshape(64)
    slab_np[1, :64] = np.asarray(b1, np.float32).reshape(64)
    slab_np[2, :32] = np.asarray(b2, np.float32).reshape(32)
    slab_np[3, :32] = np.asarray(w3, np.float32).reshape(32)
    slab_np[4, 0] = np.asarray(b3, np.float32).reshape(())
    slab_np[8:_SLAB_ROWS, :32] = np.asarray(w2, np.float32).reshape(64, 32)
    slab = jnp.asarray(slab_np)

    # Explicit VMEM budget: tables + slab resident (x2 buffers headroom),
    # clamped to v7x's 64 MiB physical VMEM.
    est = 2 * (ptab.nbytes + qtab.nbytes) + 2 * slab.nbytes + (4 << 20)
    vmem_limit = int(min(max(est, 32 << 20), 64 << 20))

    def _batched(user_ids, item_ids):
        user_ids = jnp.asarray(user_ids, jnp.int32).reshape(-1)
        item_ids = jnp.asarray(item_ids, jnp.int32).reshape(-1)
        bsz = user_ids.shape[0]
        # Absolute row index of each sub-model's embedding inside the
        # concatenated tables (tiny, fused under jit).
        u_rows = p_off_j[None, :] + user_ids[:, None]      # (B, M) int32
        i_rows = q_off_j[None, :] + item_ids[:, None]      # (B, M) int32

        grid_spec = pltpu.PrefetchScalarGridSpec(
            num_scalar_prefetch=2,                         # u_rows, i_rows -> SMEM
            grid=(bsz,),
            in_specs=[
                pl.BlockSpec((tp, d), lambda b, u, i: (0, 0)),          # resident
                pl.BlockSpec((tq, d), lambda b, u, i: (0, 0)),          # resident
                pl.BlockSpec((_SLAB_ROWS, 128), lambda b, u, i: (0, 0)),  # resident
            ],
            out_specs=pl.BlockSpec((1, 1, num_models), lambda b, u, i: (b, 0, 0)),
        )
        out = pl.pallas_call(
            _meta_model_kernel,
            out_shape=jax.ShapeDtypeStruct((bsz, 1, num_models), jnp.float32),
            grid_spec=grid_spec,
            compiler_params=pltpu.CompilerParams(
                dimension_semantics=("parallel",),   # v7x: both TCs for B >= 2
                vmem_limit_bytes=vmem_limit),
        )(u_rows, i_rows, ptab, qtab, slab)
        return out.reshape(bsz, num_models)

    batched = jax.jit(_batched)

    def forward(user_ids, item_ids):
        """Original MetaModel semantics: one (user, item) pair -> (M,)."""
        return batched(user_ids, item_ids)[0]

    return forward, batched


if __name__ == "__main__":
    key = jax.random.PRNGKey(0)
    kk = jax.random.split(key, 24)

    num_models = 6
    num_users, num_items, embed_dim = 10, 12, 128

    # Per-sub-model embedding tables (stand-ins for each CossineSimilarityBlock).
    persona_tables = [
        jax.random.normal(kk[m], (num_users, embed_dim), jnp.float32)
        for m in range(num_models)]
    program_tables = [
        jax.random.normal(kk[num_models + m], (num_items, embed_dim), jnp.float32)
        for m in range(num_models)]

    # Meta-MLP parameters (fc1: 1->64, fc2: 64->32, fc3: 32->1).
    w1 = jax.random.normal(kk[12], (1, 64), jnp.float32) * 0.5
    b1 = jax.random.normal(kk[13], (1, 64), jnp.float32) * 0.1
    w2 = jax.random.normal(kk[14], (64, 32), jnp.float32) * 0.2
    b2 = jax.random.normal(kk[15], (1, 32), jnp.float32) * 0.1
    w3 = jax.random.normal(kk[16], (1, 32), jnp.float32) * 0.2
    b3 = jax.random.normal(kk[17], (1, 1), jnp.float32) * 0.1
    params = (w1, b1, w2, b2, w3, b3)

    forward, batched = make_meta_model(persona_tables, program_tables, params)

    # Batched call (B pairs) + original single-pair call.
    B = 4
    user_ids = jax.random.randint(kk[18], (B,), 0, num_users, dtype=jnp.int32)
    item_ids = jax.random.randint(kk[19], (B,), 0, num_items, dtype=jnp.int32)

    out = jax.block_until_ready(batched(user_ids, item_ids))          # (B, M)
    single = jax.block_until_ready(forward(user_ids[0:1], item_ids[0:1]))  # (M,)

    # ---- Pure-JAX reference (mirrors the PyTorch forward) ------------------
    def ref_pair(uid, iid):
        scores = []
        for m in range(num_models):
            uu = persona_tables[m][uid]
            vv = program_tables[m][iid]
            w12 = jnp.sum(uu * vv)
            wuu = jnp.sum(uu * uu)
            wvv = jnp.sum(vv * vv)
            scores.append(w12 / jnp.sqrt(jnp.maximum(wuu * wvv, _EPS * _EPS)))
        x = jnp.stack(scores).reshape(num_models, 1)      # torch.Tensor([...])
        h1 = jnp.maximum(x @ w1 + b1, 0.0)                # relu(fc1)
        h2 = jnp.maximum(h1 @ w2 + b2, 0.0)               # relu(fc2)
        return (h2 @ w3.T + b3).reshape(num_models)       # fc3 + squeeze

    ref = jnp.stack([ref_pair(int(user_ids[bb]), int(item_ids[bb]))
                     for bb in range(B)])

    assert out.shape == (B, num_models)
    assert single.shape == (num_models,)
    assert jnp.allclose(out, ref, atol=1e-4, rtol=1e-4), (out, ref)
    assert jnp.allclose(single, ref[0], atol=1e-4, rtol=1e-4), (single, ref[0])

    print("KERNEL_OK")
</pallas_src>

<mosaic_0001>
module attributes {stable_mosaic.version = 11 : i64} {
  func.func @_meta_model_kernel(%arg0: i32, %arg1: memref<4x6xi32, #tpu.memory_space<smem>>, %arg2: memref<4x6xi32, #tpu.memory_space<smem>>, %arg3: memref<60x128xf32, #tpu.memory_space<vmem>>, %arg4: memref<72x128xf32, #tpu.memory_space<vmem>>, %arg5: memref<72x128xf32, #tpu.memory_space<vmem>>, %arg6: memref<1x1x6xf32, #tpu.memory_space<vmem>>) attributes {dimension_semantics = [#tpu.dimension_semantics<parallel>], iteration_bounds = array<i64: 4>, scalar_prefetch = 2 : i64, scratch_operands = 0 : i64, tpu.core_type = #tpu.core_type<tc>, window_params = [{pipeline_mode = #tpu.pipeline_mode<synchronous>, transform_indices = @transform_0, window_bounds = array<i64: 60, 128>}, {pipeline_mode = #tpu.pipeline_mode<synchronous>, transform_indices = @transform_1, window_bounds = array<i64: 72, 128>}, {pipeline_mode = #tpu.pipeline_mode<synchronous>, transform_indices = @transform_2, window_bounds = array<i64: 72, 128>}, {transform_indices = @transform_3, window_bounds = array<i64: 1, 1, 6>}]} {
    %0 = arith.index_cast %arg0 : i32 to index
    %c0 = arith.constant 0 : index
    %1 = memref.load %arg1[%0, %c0] : memref<4x6xi32, #tpu.memory_space<smem>>
    %2 = arith.index_cast %1 : i32 to index
    %c0_0 = arith.constant 0 : index
    %3 = vector.load %arg3[%2, %c0_0] : memref<60x128xf32, #tpu.memory_space<vmem>>, vector<1x128xf32>
    %4 = arith.index_cast %arg0 : i32 to index
    %c1 = arith.constant 1 : index
    %5 = memref.load %arg1[%4, %c1] : memref<4x6xi32, #tpu.memory_space<smem>>
    %6 = arith.index_cast %5 : i32 to index
    %c0_1 = arith.constant 0 : index
    %7 = vector.load %arg3[%6, %c0_1] : memref<60x128xf32, #tpu.memory_space<vmem>>, vector<1x128xf32>
    %8 = arith.index_cast %arg0 : i32 to index
    %c2 = arith.constant 2 : index
    %9 = memref.load %arg1[%8, %c2] : memref<4x6xi32, #tpu.memory_space<smem>>
    %10 = arith.index_cast %9 : i32 to index
    %c0_2 = arith.constant 0 : index
    %11 = vector.load %arg3[%10, %c0_2] : memref<60x128xf32, #tpu.memory_space<vmem>>, vector<1x128xf32>
    %12 = arith.index_cast %arg0 : i32 to index
    %c3 = arith.constant 3 : index
    %13 = memref.load %arg1[%12, %c3] : memref<4x6xi32, #tpu.memory_space<smem>>
    %14 = arith.index_cast %13 : i32 to index
    %c0_3 = arith.constant 0 : index
    %15 = vector.load %arg3[%14, %c0_3] : memref<60x128xf32, #tpu.memory_space<vmem>>, vector<1x128xf32>
    %16 = arith.index_cast %arg0 : i32 to index
    %c4 = arith.constant 4 : index
    %17 = memref.load %arg1[%16, %c4] : memref<4x6xi32, #tpu.memory_space<smem>>
    %18 = arith.index_cast %17 : i32 to index
    %c0_4 = arith.constant 0 : index
    %19 = vector.load %arg3[%18, %c0_4] : memref<60x128xf32, #tpu.memory_space<vmem>>, vector<1x128xf32>
    %20 = arith.index_cast %arg0 : i32 to index
    %c5 = arith.constant 5 : index
    %21 = memref.load %arg1[%20, %c5] : memref<4x6xi32, #tpu.memory_space<smem>>
    %22 = arith.index_cast %21 : i32 to index
    %c0_5 = arith.constant 0 : index
    %23 = vector.load %arg3[%22, %c0_5] : memref<60x128xf32, #tpu.memory_space<vmem>>, vector<1x128xf32>
    %24 = tpu.concatenate %3, %7, %11, %15, %19, %23 in 0 : vector<1x128xf32>, vector<1x128xf32>, vector<1x128xf32>, vector<1x128xf32>, vector<1x128xf32>, vector<1x128xf32> -> vector<6x128xf32>
    %25 = arith.index_cast %arg0 : i32 to index
    %c0_6 = arith.constant 0 : index
    %26 = memref.load %arg2[%25, %c0_6] : memref<4x6xi32, #tpu.memory_space<smem>>
    %27 = arith.index_cast %26 : i32 to index
    %c0_7 = arith.constant 0 : index
    %28 = vector.load %arg4[%27, %c0_7] : memref<72x128xf32, #tpu.memory_space<vmem>>, vector<1x128xf32>
    %29 = arith.index_cast %arg0 : i32 to index
    %c1_8 = arith.constant 1 : index
    %30 = memref.load %arg2[%29, %c1_8] : memref<4x6xi32, #tpu.memory_space<smem>>
    %31 = arith.index_cast %30 : i32 to index
    %c0_9 = arith.constant 0 : index
    %32 = vector.load %arg4[%31, %c0_9] : memref<72x128xf32, #tpu.memory_space<vmem>>, vector<1x128xf32>
    %33 = arith.index_cast %arg0 : i32 to index
    %c2_10 = arith.constant 2 : index
    %34 = memref.load %arg2[%33, %c2_10] : memref<4x6xi32, #tpu.memory_space<smem>>
    %35 = arith.index_cast %34 : i32 to index
    %c0_11 = arith.constant 0 : index
    %36 = vector.load %arg4[%35, %c0_11] : memref<72x128xf32, #tpu.memory_space<vmem>>, vector<1x128xf32>
    %37 = arith.index_cast %arg0 : i32 to index
    %c3_12 = arith.constant 3 : index
    %38 = memref.load %arg2[%37, %c3_12] : memref<4x6xi32, #tpu.memory_space<smem>>
    %39 = arith.index_cast %38 : i32 to index
    %c0_13 = arith.constant 0 : index
    %40 = vector.load %arg4[%39, %c0_13] : memref<72x128xf32, #tpu.memory_space<vmem>>, vector<1x128xf32>
    %41 = arith.index_cast %arg0 : i32 to index
    %c4_14 = arith.constant 4 : index
    %42 = memref.load %arg2[%41, %c4_14] : memref<4x6xi32, #tpu.memory_space<smem>>
    %43 = arith.index_cast %42 : i32 to index
    %c0_15 = arith.constant 0 : index
    %44 = vector.load %arg4[%43, %c0_15] : memref<72x128xf32, #tpu.memory_space<vmem>>, vector<1x128xf32>
    %45 = arith.index_cast %arg0 : i32 to index
    %c5_16 = arith.constant 5 : index
    %46 = memref.load %arg2[%45, %c5_16] : memref<4x6xi32, #tpu.memory_space<smem>>
    %47 = arith.index_cast %46 : i32 to index
    %c0_17 = arith.constant 0 : index
    %48 = vector.load %arg4[%47, %c0_17] : memref<72x128xf32, #tpu.memory_space<vmem>>, vector<1x128xf32>
    %49 = tpu.concatenate %28, %32, %36, %40, %44, %48 in 0 : vector<1x128xf32>, vector<1x128xf32>, vector<1x128xf32>, vector<1x128xf32>, vector<1x128xf32>, vector<1x128xf32> -> vector<6x128xf32>
    %50 = arith.mulf %24, %49 : vector<6x128xf32>
    %cst = arith.constant dense<0.000000e+00> : vector<6xf32>
    %51 = vector.multi_reduction <add>, %50, %cst [1] : vector<6x128xf32> to vector<6xf32>
    %52 = vector.shape_cast %51 : vector<6xf32> to vector<6x1xf32>
    %53 = arith.mulf %24, %24 : vector<6x128xf32>
    %cst_18 = arith.constant dense<0.000000e+00> : vector<6xf32>
    %54 = vector.multi_reduction <add>, %53, %cst_18 [1] : vector<6x128xf32> to vector<6xf32>
    %55 = vector.shape_cast %54 : vector<6xf32> to vector<6x1xf32>
    %56 = arith.mulf %49, %49 : vector<6x128xf32>
    %cst_19 = arith.constant dense<0.000000e+00> : vector<6xf32>
    %57 = vector.multi_reduction <add>, %56, %cst_19 [1] : vector<6x128xf32> to vector<6xf32>
    %58 = vector.shape_cast %57 : vector<6xf32> to vector<6x1xf32>
    %59 = arith.mulf %55, %58 : vector<6x1xf32>
    %cst_20 = arith.constant 1.000000e-16 : f32
    %60 = vector.broadcast %cst_20 : f32 to vector<6x1xf32>
    %61 = arith.maximumf %59, %60 : vector<6x1xf32>
    %62 = math.rsqrt %61 : vector<6x1xf32>
    %63 = arith.mulf %52, %62 : vector<6x1xf32>
    %c0_21 = arith.constant 0 : index
    %c0_22 = arith.constant 0 : index
    %64 = vector.load %arg5[%c0_21, %c0_22] : memref<72x128xf32, #tpu.memory_space<vmem>>, vector<1x64xf32>
    %c1_23 = arith.constant 1 : index
    %c0_24 = arith.constant 0 : index
    %65 = vector.load %arg5[%c1_23, %c0_24] : memref<72x128xf32, #tpu.memory_space<vmem>>, vector<1x64xf32>
    %c2_25 = arith.constant 2 : index
    %c0_26 = arith.constant 0 : index
    %66 = vector.load %arg5[%c2_25, %c0_26] : memref<72x128xf32, #tpu.memory_space<vmem>>, vector<1x32xf32>
    %c3_27 = arith.constant 3 : index
    %c0_28 = arith.constant 0 : index
    %67 = vector.load %arg5[%c3_27, %c0_28] : memref<72x128xf32, #tpu.memory_space<vmem>>, vector<1x32xf32>
    %c4_29 = arith.constant 4 : index
    %c0_30 = arith.constant 0 : index
    %68 = vector.load %arg5[%c4_29, %c0_30] : memref<72x128xf32, #tpu.memory_space<vmem>>, vector<1x1xf32>
    %c8 = arith.constant 8 : index
    %c0_31 = arith.constant 0 : index
    %69 = vector.load %arg5[%c8, %c0_31] : memref<72x128xf32, #tpu.memory_space<vmem>>, vector<64x32xf32>
    %70 = vector.broadcast %63 : vector<6x1xf32> to vector<6x64xf32>
    %71 = vector.broadcast %64 : vector<1x64xf32> to vector<6x64xf32>
    %72 = arith.mulf %70, %71 : vector<6x64xf32>
    %73 = vector.broadcast %65 : vector<1x64xf32> to vector<6x64xf32>
    %74 = arith.addf %72, %73 : vector<6x64xf32>
    %cst_32 = arith.constant 0.000000e+00 : f32
    %75 = vector.broadcast %cst_32 : f32 to vector<6x64xf32>
    %76 = arith.maximumf %74, %75 : vector<6x64xf32>
    %cst_33 = arith.constant dense<0.000000e+00> : vector<6x32xf32>
    %77 = tpu.matmul %76, %69, %cst_33 {dimension_numbers = #tpu.dot_dimension_numbers<[1], [0], [0], [1], [0, 0, 1, 1], [], []>} : vector<6x64xf32>, vector<64x32xf32>, vector<6x32xf32> -> vector<6x32xf32>
    %78 = vector.broadcast %66 : vector<1x32xf32> to vector<6x32xf32>
    %79 = arith.addf %77, %78 : vector<6x32xf32>
    %cst_34 = arith.constant 0.000000e+00 : f32
    %80 = vector.broadcast %cst_34 : f32 to vector<6x32xf32>
    %81 = arith.maximumf %79, %80 : vector<6x32xf32>
    %cst_35 = arith.constant dense<0.000000e+00> : vector<1x6xf32>
    %82 = tpu.matmul %67, %81, %cst_35 {dimension_numbers = #tpu.dot_dimension_numbers<[1], [1], [0], [0], [0, 0, 1, 0], [], []>} : vector<1x32xf32>, vector<6x32xf32>, vector<1x6xf32> -> vector<1x6xf32>
    %83 = vector.broadcast %68 : vector<1x1xf32> to vector<1x6xf32>
    %84 = arith.addf %82, %83 : vector<1x6xf32>
    %85 = vector.shape_cast %84 : vector<1x6xf32> to vector<1x1x6xf32>
    %c0_36 = arith.constant 0 : index
    %c0_37 = arith.constant 0 : index
    %c0_38 = arith.constant 0 : index
    %86 = vector.load %arg6[%c0_36, %c0_37, %c0_38] : memref<1x1x6xf32, #tpu.memory_space<vmem>>, vector<1x1x6xf32>
    tpu.vector_store %arg6[%c0_36, %c0_37, %c0_38], %85 {strides = array<i32>} : memref<1x1x6xf32, #tpu.memory_space<vmem>>, vector<1x1x6xf32>,
    return
  }
  func.func @transform_0(%arg0: i32, %arg1: memref<4x6xi32, #tpu.memory_space<smem>>, %arg2: memref<4x6xi32, #tpu.memory_space<smem>>) -> (i32, i32) {
    %c0_i32 = arith.constant 0 : i32
    %c0_i32_0 = arith.constant 0 : i32
    %c0_i32_1 = arith.constant 0 : i32
    return %c0_i32, %c0_i32_0 : i32, i32
  }
  func.func @transform_1(%arg0: i32, %arg1: memref<4x6xi32, #tpu.memory_space<smem>>, %arg2: memref<4x6xi32, #tpu.memory_space<smem>>) -> (i32, i32) {
    %c0_i32 = arith.constant 0 : i32
    %c0_i32_0 = arith.constant 0 : i32
    %c0_i32_1 = arith.constant 0 : i32
    return %c0_i32, %c0_i32_0 : i32, i32
  }
  func.func @transform_2(%arg0: i32, %arg1: memref<4x6xi32, #tpu.memory_space<smem>>, %arg2: memref<4x6xi32, #tpu.memory_space<smem>>) -> (i32, i32) {
    %c0_i32 = arith.constant 0 : i32
    %c0_i32_0 = arith.constant 0 : i32
    %c0_i32_1 = arith.constant 0 : i32
    return %c0_i32, %c0_i32_0 : i32, i32
  }
  func.func @transform_3(%arg0: i32, %arg1: memref<4x6xi32, #tpu.memory_space<smem>>, %arg2: memref<4x6xi32, #tpu.memory_space<smem>>) -> (i32, i32, i32) {
    %c0_i32 = arith.constant 0 : i32
    %c0_i32_0 = arith.constant 0 : i32
    %c0_i32_1 = arith.constant 0 : i32
    return %arg0, %c0_i32, %c0_i32_0 : i32, i32, i32
  }
}

</mosaic_0001>

<bundles_post_ra>
// kernel: _batched.1
= control target key start
LH: loop header
LB: loop body
LE: loop exit
PB: predicated region body
PF: predicated region fallthrough
CT: control target
= control target key end

     0   :  { %s788_s24 = smov [#allocation3]   ;;  %s789_s25 = smov [#allocation4]   ;;  %s988_s0 = inlined_call_operand.vmem [shape: s32[4,6], index: 0, kind: input, shape index: {}]   ;;  %s989_s2 = inlined_call_operand.hbm [shape: f32[60,128], index: 2, kind: input, shape index: {}]   ;;  %s990_s3 = inlined_call_operand.hbm [shape: f32[72,128], index: 3, kind: input, shape index: {}]   ;;  %s991_s4 = inlined_call_operand.hbm [shape: f32[72,128], index: 4, kind: input, shape index: {}]   ;;  %s992_s5 = inlined_call_operand.hbm [shape: f32[4,1,6], index: 5, kind: output, shape index: {}]   ;;  %s993_s1 = inlined_call_operand.vmem [shape: s32[4,6], index: 1, kind: input, shape index: {}]  }
   0x1   :  { %994 = sst [smem:[#allocation16_spill]] %s989_s2  ;;  %s11_s20 = sshll.u32 %s988_s0, 4  ;;  %s12_s20 = int_to_ptr.vmem [resolvable:$true] %s11_s20 }
   0x2   :  { %995 = sst [smem:[#allocation17_spill]] %s990_s3  ;;  %s16_s23 = sshll.u32 %s993_s1, 4  ;;  %s17_s23 = int_to_ptr.vmem [resolvable:$true] %s16_s23 }
   0x3   :  { %14 = dma.vmem_to_smem %s12_s20, 64, %s788_s24, [#allocation2] }
   0x4   :  { %19 = dma.vmem_to_smem %s17_s23, 64, %s789_s25, [#allocation2] }
   0x5   :  { %758 = dma.done.wait [#allocation2], 128 }
   0x6   :  { %759 = vsyncadd [#allocation2], 4294967168 }
   0x7   :  { %22 = sfence }
   0x8   :  { %23 = vsyncpa [#allocation6], 0 }
   0x9   :  { %24 = vsyncpa [#allocation9], 0 }
   0xa   :  { %25 = vsyncpa [#allocation7], 0 }
   0xb   :  { %27 = vsyncpa [#allocation7 + $0x1], 0  ;;  %s832_s26 = smov 0   ;;  %s834_s0 = smov 0  }
   0xc   :  { %s836_s27 = smov 0   ;;  %s838_s1 = smov 0  }
   0xd LB: > { %s853_s28 = sadd.s32 4294967295, %s786_s1   ;;  %s503_s29 = sadd.s32 4294967294, %s786_s1   ;;  %s786_s1 = sphi %s838_s1, %s1005_s1   ;;  %s782_s27 = sphi %s836_s27, %s1004_s27   ;;  %s778_s0 = sphi %s834_s0, %s1003_s0   ;;  %s774_s26 = sphi %s832_s26, %s1002_s26  }
   0xe   : > { %s857_s30 = sadd.s32 1, %s786_s1   ;;  %s103_s6 = sadd.s32 1, %s782_s27 }
   0xf   : > { %s100_s7 = ssub.s32 %s786_s1, %s857_s30  ;;  %p113_p0 = scmp.ne.s32.totalorder %s782_s27, %s778_s0 }
  0x10   : > { %p101_p1 = scmp.eq.s32.totalorder %s100_s7, 0  ;;  %p114_p2 = scmp.eq.s32.totalorder %s853_s28, 3 }
  0x11   : > { %p119_p3 = scmp.ne.s32.totalorder %s778_s0, %s774_s26  ;;  %p120_p4 = scmp.eq.s32.totalorder %s503_s29, 3 }
  0x12   : > { %s868_s8 = scalar_select %p101_p1, %s782_s27, %s103_s6  }
  0x13   : > { %p870_p5 = por %p114_p2, %p113_p0  ;;  %p874_p6 = por %p120_p4, %p119_p3 }
  0x14   : > { %p504_p7 = scmp.ge.s32.totalorder %s786_s1, 1  ;;  %p127_p8 = scmp.lt.s32.totalorder %s786_s1, 5 }
  0x15   : > { %p546_p9 = scmp.eq.s32.totalorder %s853_s28, 0  ;;  %s999_s3 = sld [smem:[#allocation17_spill]] }
  0x16   : > { %p881_p10 = pnand %p504_p7, %p127_p8  ;;  %s1000_s2 = sld [smem:[#allocation16_spill]] }
  0x17   : > { %s790_s19 = smov [#allocation8]   ;;  %s791_s21 = smov 128  }
  0x18   : > { %p532_p11 = pneg %p881_p10  ;;  %s154_s20 = sshll.u32 %s790_s19, 4  ;;  %s155_s20 = int_to_ptr.vmem [resolvable:$true] %s154_s20 }
  0x19   : > { %s792_s22 = smov 8   ;;  %s793_s23 = smov [#allocation5]  }
  0x1a   : > { %p895_p12 = pnand %p546_p9, %p532_p11  ;;  %s140_s24 = sshll.u32 %s793_s23, 4  ;;  %s141_s24 = int_to_ptr.vmem [resolvable:$true] %s140_s24 }
  0x1b   : > { %s152_s14 = sshll.u32 %s999_s3, 4  ;;  %s166_s6 = sshll.u32 %s991_s4, 4  ;;  %s153_s14 = int_to_ptr.hbm [resolvable:$true] %s152_s14  ;;  %s167_s6 = int_to_ptr.hbm [resolvable:$true] %s166_s6 }
  0x1c   : > { %s138_s17 = sshll.u32 %s1000_s2, 4  ;;  %s794_s7 = smov [#allocation10]   ;;  %s139_s17 = int_to_ptr.hbm [resolvable:$true] %s138_s17 }
  0x1d   : > { %538 = dma.hbm_to_vmem [thread:$0]  (!%p895_p12), %s153_s14, 1152, %s155_s20, [#allocation9], %s791_s21, %s791_s21, %s792_s22  }
  0x1e   : > { %535 = dma.hbm_to_vmem [thread:$0]  (!%p895_p12), %s139_s17, 1024, %s141_s24, [#allocation6], %s791_s21, %s791_s21, %s792_s22  }
  0x1f   : > { %s168_s12 = sshll.u32 %s794_s7, 4  ;;  %184 = sbr.rel (%p881_p10) target bundleno = 477 (0x1dd), region = 32  ;;  %s169_s12 = int_to_ptr.vmem [resolvable:$true] %s168_s12 }
  0x20   : > { %541 = dma.hbm_to_vmem [thread:$0]  (!%p895_p12), %s167_s6, 1152, %s169_s12, [#allocation9], %s791_s21, %s791_s21, %s792_s22  }
  0x24   : > { %761 = dma.done.wait (%p546_p9), [#allocation6], 1024  }
  0x25   : > { %763 = vsyncadd (%p546_p9), [#allocation6], 4294966272 }
  0x26   : > { %765 = dma.done.wait (%p546_p9), [#allocation9], 2304  }
  0x27   : > { %767 = vsyncadd (%p546_p9), [#allocation9], 4294964992  ;;  %s919_s13 = sshll.u32 %s853_s28, 7  ;;  %vm252_vm0 = vcmask 1040384   ;;  %vm254_vm1 = vcmask 1041408   ;;  %vm256_vm2 = vcmask 1042432  }
  0x28   : > { %s214_s11 = sld [smem:[#allocation3 + %s919_s13]]  ;;  %s217_s14 = sadd.s32 1, %s919_s13  ;;  %vm258_vm3 = vcmask 1043456   ;;  %vm260_vm4 = vcmask 1044480   ;;  %vm301_vm5 = vcmask 1045504   ;;  %v338_v38 = vld [vmem:[#allocation10 + $0x40] sm:$0xff] }
  0x29   : > { %s218_s15 = sld [smem:[#allocation3 + %s217_s14]]  ;;  %s221_s16 = sadd.s32 2, %s919_s13  ;;  %357 = vmatpush.msra.mxu0 %v338_v38  ;;  %v337_v39 = vld [vmem:[#allocation10 + $0x38] sm:$0xff]  ;;  %v336_v40 = vld [vmem:[#allocation10 + $0x30] sm:$0xff]  ;;  %v335_v41 = vld [vmem:[#allocation10 + $0x28] sm:$0xff]  ;;  %vm345_vm9 = vcmask 523264  }
  0x2a   : > { %s222_s17 = sld [smem:[#allocation3 + %s221_s16]]  ;;  %s225_s18 = sadd.s32 3, %s919_s13  ;;  %v334_v42 = vld [vmem:[#allocation10 + $0x20] sm:$0xff]  ;;  %v333_v44 = vld [vmem:[#allocation10 + $0x18] sm:$0xff]  ;;  %v332_v45 = vld [vmem:[#allocation10 + $0x10] sm:$0xff]  ;;  %vm375_vm10 = vcmask 261120  }
  0x2b   : > { %s226_s19 = sld [smem:[#allocation3 + %s225_s18]]  ;;  %s229_s20 = sadd.s32 4, %s919_s13  ;;  %358 = vmatpush.msra.mxu0 %v337_v39  ;;  %v331_v46 = vld [vmem:[#allocation10 + $0x8] sm:$0xff]  ;;  %v595_v57 = vld [vmem:[#allocation10] ss:$0 sm:$0xff]  ;;  %vm402_vm11 = vcmask 40960  }
  0x2c   : > { %s230_s21 = sld [smem:[#allocation3 + %s229_s20]]  ;;  %s233_s22 = sadd.s32 5, %s919_s13  ;;  %v596_v60 = vld [vmem:[#allocation10 + $0x1] ss:$0 sm:$0xff] }
  0x2d   : > { %s234_s23 = sld [smem:[#allocation3 + %s233_s22]]  ;;  %359 = vmatpush.msra.mxu0 %v336_v40 }
  0x2e   : > { %s928_s24 = sld [smem:[#allocation4 + %s919_s13]]  ;;  %s215_s29 = scalar_lea.vmem [#allocation5], %s214_s11 }
  0x2f   : > { %s930_s25 = sld [smem:[#allocation4 + %s217_s14]]  ;;  %v216_v0 = vld [vmem:[%s215_s29] sm:$0x1]  ;;  %s219_s6 = scalar_lea.vmem [#allocation5], %s218_s15  ;;  %360 = vmatpush.msra.mxu0 %v335_v41 }
  0x30   : > { %v220_v1 = vld [vmem:[%s219_s6] sm:$0x1]  ;;  %s932_s7 = sld [smem:[#allocation4 + %s221_s16]]  ;;  %s223_s12 = scalar_lea.vmem [#allocation5], %s222_s17 }
  0x31   : > { %v224_v2 = vld [vmem:[%s223_s12] sm:$0x1]  ;;  %v238_v3 = vrot.slane %v220_v1, 7  ;;  %s934_s2 = sld [smem:[#allocation4 + %s225_s18]]  ;;  %s227_s3 = scalar_lea.vmem [#allocation5], %s226_s19  ;;  %361 = vmatpush.msra.mxu0 %v334_v42  ;;  %v795_v1 = vmov 0  }
  0x32   : > { %v228_v4 = vld [vmem:[%s227_s3] sm:$0x1]  ;;  %v241_v5 = vrot.slane %v224_v2, 6  ;;  %s936_s13 = sld [smem:[#allocation4 + %s229_s20]]  ;;  %s231_s14 = scalar_lea.vmem [#allocation5], %s230_s21  ;;  %593 = vset.pattern.permute.xlu1 %v795_v1  ;;  %594 = vset.pattern.permute.xlu0 %v795_v1 }
  0x33   : > { %v232_v6 = vld [vmem:[%s231_s14] sm:$0x1]  ;;  %v244_v7 = vrot.slane %v228_v4, 5  ;;  %v253_v8 = vsel %vm252_vm0, %v216_v0, %v238_v3  ;;  %s277_s11 = sld [smem:[#allocation4 + %s233_s22]]  ;;  %s235_s15 = scalar_lea.vmem [#allocation5], %s234_s23  ;;  %362 = vmatpush.msra.mxu0 %v333_v44 }
  0x34   : > { %v236_v9 = vld [vmem:[%s235_s15] sm:$0x1]  ;;  %v247_v10 = vrot.slane %v232_v6, 4  ;;  %v255_v11 = vsel %vm254_vm1, %v253_v8, %v241_v5  ;;  %s263_s3 = scalar_lea.vmem [#allocation8], %s928_s24  ;;  %v330_v0 = vld [vmem:[#allocation10 + $0x4] sm:$0x1]  ;;  %s413_s23 = scalar_lea.hbm %s992_s5, %s853_s28 }
  0x35   : > { %v250_v12 = vrot.slane %v236_v9, 3  ;;  %v257_v13 = vsel %vm256_vm2, %v255_v11, %v244_v7  ;;  %v264_v15 = vld [vmem:[%s263_s3] sm:$0x1]  ;;  %s266_s16 = scalar_lea.vmem [#allocation8], %s930_s25  ;;  %363 = vmatpush.msra.mxu0 %v332_v45  ;;  %v597_v2 = vld [vmem:[#allocation10 + $0x2] ss:$0 sm:$0xff] }
  0x36   : > { %v259_v14 = vsel %vm258_vm3, %v257_v13, %v247_v10  ;;  %v267_v16 = vld [vmem:[%s266_s16] sm:$0x1]  ;;  %s269_s17 = scalar_lea.vmem [#allocation8], %s932_s7  ;;  %v329_v6 = vld [vmem:[#allocation10 + $0x3] sm:$0x1]  ;;  %s417_s29 = sshll.u32 %s413_s23, 4  ;;  %s418_s29 = int_to_ptr.hbm [resolvable:$true] %s417_s29 }
  0x37   : > { %v261_v17 = vsel %vm260_vm4, %v259_v14, %v250_v12  ;;  %v270_v18 = vld [vmem:[%s269_s17] sm:$0x1]  ;;  %v281_v19 = vrot.slane %v267_v16, 7  ;;  %s272_s18 = scalar_lea.vmem [#allocation8], %s934_s2  ;;  %364 = vmatpush.msra.mxu0 %v331_v46  ;;  %s211_s2 = sand.u32 1, %s778_s0  }
  0x38   : > { %v305_v20 = vmul.f32 %v261_v17, %v261_v17  ;;  %v273_v21 = vld [vmem:[%s272_s18] sm:$0x1]  ;;  %v284_v22 = vrot.slane %v270_v18, 6  ;;  %s275_s19 = scalar_lea.vmem [#allocation8], %s936_s13  ;;  %s212_s24 = scalar_lea.vmem [#allocation11], %s211_s2 }
  0x39   : > { %v276_v23 = vld [vmem:[%s275_s19] sm:$0x1]  ;;  %v287_v24 = vrot.slane %v273_v21, 5  ;;  %v295_v25 = vsel %vm252_vm0, %v264_v15, %v281_v19  ;;  %s278_s20 = scalar_lea.vmem [#allocation8], %s277_s11  ;;  %s415_s25 = sshll.u32 %s212_s24, 4  ;;  %s416_s25 = int_to_ptr.vmem [resolvable:$true] %s415_s25 }
  0x3a   : > { %v306_v26 = vsel %vm301_vm5, %v305_v20, 0.0  ;;  %v279_v27 = vld [vmem:[%s278_s20] sm:$0x1]  ;;  %v290_v28 = vrot.slane %v276_v23, 4  ;;  %v296_v29 = vsel %vm254_vm1, %v295_v25, %v284_v22  ;;  %s405_s6 = scalar_lea.sflag [#allocation7], %s211_s2  ;;  %s728_s7 = sshra.s32 %s418_s29, 4  ;;  %s729_s7 = int_to_ptr.hbm [resolvable:$true] %s728_s7 }
  0x3b   : > { %307 = vadd.xlane.f32.xlu0 %v306_v26  ;;  %v293_v30 = vrot.slane %v279_v27, 3  ;;  %v297_v31 = vsel %vm256_vm2, %v296_v29, %v287_v24  ;;  %s730_s12 = scalar_lea.hbm %s729_s7, 1  ;;  %s734_s14 = scalar_lea.hbm %s992_s5, 4 }
  0x3c   : > { %v298_v32 = vsel %vm258_vm3, %v297_v31, %v290_v28  ;;  %p731_p13 = scmp.ne.s32.totalorder %s729_s7, %s730_s12  ;;  %p735_p2 = scmp.lt.s32.totalorder %s729_s7, %s992_s5 }
  0x3d   : > { %v299_v33 = vsel %vm260_vm4, %v298_v32, %v293_v30  ;;  %p736_p3 = scmp.lt.s32.totalorder %s734_s14, %s730_s12 }
  0x3e   : > { %v309_v34 = vmul.f32 %v299_v33, %v299_v33  ;;  %v300_v35 = vmul.f32 %v299_v33, %v261_v17  ;;  %p732_p0 = pnand %p731_p13, %p870_p5 }
  0x3f   : > { %p737_p4 = por %p736_p3, %p735_p2 }
  0x40   : > { %v310_v36 = vsel %vm301_vm5, %v309_v34, 0.0  ;;  %v302_v37 = vsel %vm301_vm5, %v300_v35, 0.0  ;;  %p733_p1 = pneg %p732_p0 }
  0x41   : > { %303 = vadd.xlane.f32.xlu1 %v302_v37 }
  0x42   : > { %p738_p7 = pnand %p737_p4, %p733_p1 }
  0x43   : > { %311 = vadd.xlane.f32.xlu0 %v310_v36 }
  0x5a   : > { %372 = vperm.xlu1 %593, %v330_v0  }
  0xae   : > { %v308_v43 = vpop.xlane.xlu0 %307 }
  0xb4   : > { %v304_v56 = vpop.xlane.xlu1 %303 }
  0xb6   : > { %v312_v47 = vpop.xlane.xlu0 %311 }
  0xb7   : > { %v313_v48 = vmul.f32 %v312_v47, %v308_v43 }
  0xb9   : > { %v314_v49 = vmax.f32 %v313_v48, 1e-16 }
  0xbb   : > { %598 = vrsqrt.f32 %v314_v49  ;;  %vm321_vm7 = vweird.f32 %v314_v49 }
  0xc1   : > { %v599_v50 = vpop.eup %598 }
  0xc2   : > { %v316_v51 = vmul.f32 %v599_v50, %v314_v49  ;;  %vm322_vm6 = vweird.f32 %v599_v50 }
  0xc3   : > { %vm323_vm8 = vmor %vm321_vm7, %vm322_vm6 }
  0xc4   : > { %v317_v52 = vmul.f32 %v599_v50, %v316_v51 }
  0xc6   : > { %v318_v53 = vmul.f32 0.5, %v317_v52 }
  0xc8   : > { %v319_v54 = vsub.f32 1.5, %v318_v53 }
  0xca   : > { %v320_v55 = vmul.f32 %v599_v50, %v319_v54 }
  0xcc   : > { %v324_v58 = vsel %vm323_vm8, %v599_v50, %v320_v55  ;;  %v373_v7 = vpop.permute.xlu1 %372 }
  0xcd   : > { %v325_v59 = vmul.f32 %v324_v58, %v304_v56 }
  0xcf   : > { %v340_v61 = vmul.f32 %v595_v57, %v325_v59 }
  0xd1   : > { %v342_v62 = vadd.f32 %v596_v60, %v340_v61 }
  0xd3   : > { %v343_v63 = vmax.f32 %v342_v62, 0.0 }
  0xd5   : > { %513 = vmatmul.msk.f32.vlgmr.msra.gmra.mxu0 %vm345_vm9, %v343_v63 }
 0x152   : > { %v366_v3 = vpop.f32.mrf.mxu0 }
 0x153   : > { %v367_v4 = vadd.f32 %v597_v2, %v366_v3 }
 0x155   : > { %v369_v5 = vmax.f32 %v367_v4, 0.0 }
 0x157   : > { %514 = vmatpush.xpose.msk.msra.mxu1 %vm375_vm10, %v369_v5 }
 0x15a   : > { %515 = vmatmul.msk.f32.vlgmr.msra.gmra.mxu1 %vm375_vm10, %v329_v6 }
 0x1d7   : > { %v399_v8 = vpop.f32.mrf.mxu1 }
 0x1d8   : > { %v400_v9 = vadd.f32 %v399_v8, %v373_v7 }
 0x1da   : > { %403 = vst.msk [vmem:[%s212_s24] sm:$0x1] %vm402_vm11, %v400_v9 }
 0x1db   : > { %741 = shalt.err (!%p738_p7)
}
 0x1dc   : > { %530 = dma.vmem_to_hbm [thread:$0]  (%p870_p5), %s416_s25, 16, %s418_s29, %s405_s6  }
 0x1dd PF: > { %p552_p8 = scmp.ge.s32.totalorder %s786_s1, 2  ;;  %s429_s3 = sand.u32 1, %s774_s26  }
 0x1de   : > { %s430_s16 = scalar_lea.sflag [#allocation7], %s429_s3 }
 0x1df   : > { %p543_p9 = pnand %p552_p8, %p874_p6 }
 0x1e1   : > { %p544_p10 = pneg %p543_p9 }
 0x1e3   : > { %769 = dma.done.wait (%p544_p10), %s430_s16, 16  }
 0x1e4   : > { %771 = vsyncadd (%p544_p10), %s430_s16, 4294967280  ;;  %p30_p11 = scmp.ge.s32.totalorder %s857_s30, 6   ;;  %s1002_s26 = smov %s778_s0 }
 0x1e5   : > { %s1003_s0 = smov %s782_s27  ;;  %s1004_s27 = smov %s868_s8 }
 0x1e6   : > { %s1005_s1 = smov %s857_s30  ;;  %32 = sbr.rel (!%p30_p11) target bundleno = 13 (0xd), region = 89 }
 0x1eb   :  { %435 = vsyncpa [#allocation6], 1 }
 0x1ec   :  { %437 = vsyncpa [#allocation6 + $0x1], 1 }
 0x1ed   :  { %438 = vsyncpa [#allocation9], 1 }
 0x1ee   :  { %439 = vsyncpa [#allocation7], 1 }
 0x1ef   :  { %441 = vsyncpa [#allocation7 + $0x1], 1 }

</bundles_post_ra>
